<compile_context>
chip_gen: v5e
topology: v5e:2x2
jax: 0.10.0
libtpu: 0.0.40
codegen_flags: <defaults>
</compile_context>

<pallas_src>
import jax
import jax.numpy as jnp
from jax.experimental import pallas as pl
from jax.experimental.pallas import tpu as pltpu

IN_FEATURES = 10
OUT_FEATURES = 10


def _device_kind() -> str:
    try:
        return jax.devices()[0].device_kind.lower()
    except Exception:
        return ""


def _select_batch_tile_and_vmem():
    """Per-generation batch tile + explicit scoped-VMEM budget.

    VMEM budgeting uses the padded layout: (TB, 10) f32 occupies TB x 128 lanes
    = TB*512 B per buffer; x and out are double-buffered on the gridded path,
    so ~4*TB*512 B, plus a small slack for the resident weight/bias blocks and
    internal scratch.
    """
    kind = _device_kind()
    if "v5" in kind:
        tb = 4096          # ~8 MiB padded footprint; fits 16 MiB scoped default
    else:
        tb = 8192          # v6e / v7x / unknown: ~16 MiB padded footprint
    padded_buf_bytes = tb * 128 * 4
    vmem_limit = 4 * padded_buf_bytes + (2 << 20)   # x+out double-buffered + slack
    return tb, vmem_limit


def _batch_dim_semantics():
    kind = _device_kind()
    if "v7" in kind and hasattr(pltpu, "CORE_PARALLEL"):
        # Only core-parallel semantics reliably split the grid across v7x's
        # two TensorCores; harmless to skip on 1-TC chips.
        return (pltpu.CORE_PARALLEL,)
    return ("parallel",)


def _cost_estimate(batch):
    return pl.CostEstimate(
        flops=2 * batch * IN_FEATURES * OUT_FEATURES,
        bytes_accessed=(batch * IN_FEATURES * 4
                        + batch * OUT_FEATURES * 4
                        + IN_FEATURES * OUT_FEATURES * 4
                        + OUT_FEATURES * 4),
        transcendentals=0,
    )


def linear_kernel(x_ref, w_ref, b_ref, o_ref):
    # x: (TB or B, IN), w: (IN, OUT), b: (1, OUT), o: (TB or B, OUT)
    y = jnp.dot(x_ref[...], w_ref[...], preferred_element_type=jnp.float32)
    o_ref[...] = (y + b_ref[...]).astype(o_ref.dtype)


def linear_pallas(x, w_t, b):
    """x: (B, IN) f32, w_t: (IN, OUT) f32, b: (OUT,) f32 -> (B, OUT) f32."""
    B = x.shape[0]
    b2d = b.reshape(1, OUT_FEATURES)
    tb, vmem_limit = _select_batch_tile_and_vmem()

    if B <= tb:
        # Overhead-minimal path: single un-gridded invocation, everything
        # resident in VMEM for the whole call.
        return pl.pallas_call(
            linear_kernel,
            out_shape=jax.ShapeDtypeStruct((B, OUT_FEATURES), x.dtype),
            in_specs=[
                pl.BlockSpec(memory_space=pltpu.VMEM),
                pl.BlockSpec(memory_space=pltpu.VMEM),
                pl.BlockSpec(memory_space=pltpu.VMEM),
            ],
            out_specs=pl.BlockSpec(memory_space=pltpu.VMEM),
            cost_estimate=_cost_estimate(B),
        )(x, w_t, b2d)

    # Large-batch path: tile the batch axis with big tiles, keep the tiny
    # weight/bias blocks resident (index_map -> (0, 0)).  The tail tile
    # (B % tb != 0) is handled by Pallas' masked writeback.
    grid = (pl.cdiv(B, tb),)
    return pl.pallas_call(
        linear_kernel,
        out_shape=jax.ShapeDtypeStruct((B, OUT_FEATURES), x.dtype),
        grid=grid,
        in_specs=[
            pl.BlockSpec((tb, IN_FEATURES), lambda i: (i, 0)),
            pl.BlockSpec((IN_FEATURES, OUT_FEATURES), lambda i: (0, 0)),
            pl.BlockSpec((1, OUT_FEATURES), lambda i: (0, 0)),
        ],
        out_specs=pl.BlockSpec((tb, OUT_FEATURES), lambda i: (i, 0)),
        compiler_params=pltpu.CompilerParams(
            dimension_semantics=_batch_dim_semantics(),
            vmem_limit_bytes=vmem_limit,
        ),
        cost_estimate=_cost_estimate(B),
    )(x, w_t, b2d)


def init_params(key):
    """Deterministic init mimicking torch.nn.Linear: U(-1/sqrt(in), 1/sqrt(in))."""
    kw, kb = jax.random.split(key)
    bound = 1.0 / (IN_FEATURES ** 0.5)
    # torch stores weight as (out, in); we keep the transposed (in, out) copy.
    w = jax.random.uniform(
        kw, (OUT_FEATURES, IN_FEATURES), jnp.float32, minval=-bound, maxval=bound
    )
    b = jax.random.uniform(
        kb, (OUT_FEATURES,), jnp.float32, minval=-bound, maxval=bound
    )
    return w.T, b  # (IN, OUT), (OUT,)


if __name__ == "__main__":
    key = jax.random.PRNGKey(0)
    k_param, k_x, k_x2 = jax.random.split(key, 3)

    w_t, b = init_params(k_param)

    # Small batch (spec-consistent): exercises the un-gridded fast path.
    x_small = jax.random.normal(k_x, (8, IN_FEATURES), jnp.float32)
    y_small = linear_pallas(x_small, w_t, b)
    jax.block_until_ready(y_small)
    ref_small = jnp.dot(x_small, w_t, precision=jax.lax.Precision.HIGHEST) + b
    assert jnp.allclose(y_small, ref_small, atol=1e-5, rtol=1e-5), \
        "small-batch mismatch vs reference"

    # Gridded path with a non-multiple-of-tile batch (checks tail-tile masking).
    tb, _ = _select_batch_tile_and_vmem()
    B_big = tb + 333
    x_big = jax.random.normal(k_x2, (B_big, IN_FEATURES), jnp.float32)
    y_big = linear_pallas(x_big, w_t, b)
    jax.block_until_ready(y_big)
    ref_big = jnp.dot(x_big, w_t, precision=jax.lax.Precision.HIGHEST) + b
    assert jnp.allclose(y_big, ref_big, atol=1e-4, rtol=1e-5), \
        "large-batch (gridded) mismatch vs reference"

    print("KERNEL_OK")
</pallas_src>

<mosaic_0001>
module attributes {stable_mosaic.version = 11 : i64} {
  func.func @linear_kernel(%arg0: memref<8x10xf32, #tpu.memory_space<vmem>>, %arg1: memref<10x10xf32, #tpu.memory_space<vmem>>, %arg2: memref<1x10xf32, #tpu.memory_space<vmem>>, %arg3: memref<8x10xf32, #tpu.memory_space<vmem>>) attributes {dimension_semantics = [], scalar_prefetch = 0 : i64, scratch_operands = 0 : i64, tpu.core_type = #tpu.core_type<tc>} {
    %c0 = arith.constant 0 : index
    %c0_0 = arith.constant 0 : index
    %0 = vector.load %arg0[%c0, %c0_0] : memref<8x10xf32, #tpu.memory_space<vmem>>, vector<8x10xf32>
    %c0_1 = arith.constant 0 : index
    %c0_2 = arith.constant 0 : index
    %1 = vector.load %arg1[%c0_1, %c0_2] : memref<10x10xf32, #tpu.memory_space<vmem>>, vector<10x10xf32>
    %cst = arith.constant dense<0.000000e+00> : vector<8x10xf32>
    %2 = tpu.matmul %0, %1, %cst {dimension_numbers = #tpu.dot_dimension_numbers<[1], [0], [0], [1], [0, 0, 1, 1], [], []>} : vector<8x10xf32>, vector<10x10xf32>, vector<8x10xf32> -> vector<8x10xf32>
    %c0_3 = arith.constant 0 : index
    %c0_4 = arith.constant 0 : index
    %3 = vector.load %arg2[%c0_3, %c0_4] : memref<1x10xf32, #tpu.memory_space<vmem>>, vector<1x10xf32>
    %4 = vector.broadcast %3 : vector<1x10xf32> to vector<8x10xf32>
    %5 = arith.addf %2, %4 : vector<8x10xf32>
    %c0_5 = arith.constant 0 : index
    %c0_6 = arith.constant 0 : index
    %6 = vector.load %arg3[%c0_5, %c0_6] : memref<8x10xf32, #tpu.memory_space<vmem>>, vector<8x10xf32>
    tpu.vector_store %arg3[%c0_5, %c0_6], %5 {strides = array<i32>} : memref<8x10xf32, #tpu.memory_space<vmem>>, vector<8x10xf32>,
    return
  }
}

</mosaic_0001>

<bundles_post_ra>
// kernel: tpu_custom_call.1
= control target key start
LH: loop header
LB: loop body
LE: loop exit
PB: predicated region body
PF: predicated region fallthrough
CT: control target
= control target key end

     0   :  { %8 = vsyncpa [#allocation3], 0  ;;  %s222_s0 = inlined_call_operand.hbm [shape: f32[8,10], index: 0, kind: input, shape index: {}]   ;;  %s223_s1 = inlined_call_operand.hbm [shape: f32[10,10], index: 1, kind: input, shape index: {}]   ;;  %s224_s2 = inlined_call_operand.vmem [shape: f32[1,10], index: 2, kind: input, shape index: {}]   ;;  %s225_s3 = inlined_call_operand.hbm [shape: f32[8,10], index: 3, kind: output, shape index: {}]  }
   0x1   :  { %9 = vsyncpa [#allocation6], 0 }
   0x2   :  { %10 = vsyncpa [#allocation4], 0  ;;  %s16_s14 = sshll.u32 %s222_s0, 4  ;;  %s185_s15 = smov [#allocation2]   ;;  %s17_s14 = int_to_ptr.hbm [resolvable:$true] %s16_s14 }
   0x3   :  { %s18_s16 = sshll.u32 %s185_s15, 4  ;;  %s26_s19 = sshll.u32 %s223_s1, 4  ;;  %s19_s16 = int_to_ptr.vmem [resolvable:$true] %s18_s16  ;;  %s27_s19 = int_to_ptr.hbm [resolvable:$true] %s26_s19 }
   0x4   :  { %21 = dma.hbm_to_vmem [thread:$0]  %s17_s14, 128, %s19_s16, [#allocation3]  }
   0x5   :  { %s186_s20 = smov [#allocation5]   ;;  %s187_s22 = smov 128  }
   0x6   :  { %s28_s21 = sshll.u32 %s186_s20, 4  ;;  %s188_s23 = smov 8   ;;  %s29_s21 = int_to_ptr.vmem [resolvable:$true] %s28_s21 }
   0x7   :  { %34 = dma.hbm_to_vmem [thread:$0]  %s27_s19, 256, %s29_s21, [#allocation6], %s187_s22, %s187_s22, %s188_s23  }
   0x8   :  { %179 = dma.done.wait [#allocation3], 128  }
   0x9   :  { %180 = vsyncadd [#allocation3], 4294967168 }
   0xa   :  { %181 = dma.done.wait [#allocation6], 256  }
   0xb   :  { %182 = vsyncadd [#allocation6], 4294967040  ;;  %vm56_vm0 = vcmask 1041408   ;;  %v47_v0 = vld [vmem:[#allocation5 + $0x8] sm:$0x3]  ;;  %v46_v1 = vld [vmem:[#allocation5] sm:$0xff] }
   0xc   :  { %99 = vmatpush.msk.msra.mxu0 %vm56_vm0, %v47_v0  ;;  %v45_v2 = vld [vmem:[#allocation2] sm:$0xff]  ;;  %vm52_vm1 = vcmask 80896   ;;  %s189_s24 = smov [#allocation7]   ;;  %s88_s28 = sshll.u32 %s225_s3, 4  ;;  %s89_s28 = int_to_ptr.hbm [resolvable:$true] %s88_s28 }
   0xd   :  { %v106_v3 = vld [vmem:[%s224_s2] ss:$0 sm:$0xff]  ;;  %s86_s25 = sshll.u32 %s189_s24, 4  ;;  %s87_s25 = int_to_ptr.vmem [resolvable:$true] %s86_s25 }
   0xe   :  { %75 = vmatpush.msra.mxu0 %v46_v1 }
   0xf   :  { %100 = vmatmul.msk.f32.vlgmr.msra.gmra.mxu0 %vm52_vm1, %v45_v2 }
  0x8c   :  { %v77_v4 = vpop.f32.mrf.mxu0 }
  0x8d   :  { %v78_v5 = vadd.f32 %v106_v3, %v77_v4 }
  0x8f   :  { %80 = vst.msk [vmem:[#allocation7] sm:$0xff] %vm52_vm1, %v78_v5 }
  0x90   :  { %91 = dma.vmem_to_hbm [thread:$0]  %s87_s25, 128, %s89_s28, [#allocation4]  }
  0x91   :  { %183 = dma.done.wait [#allocation4], 128  }
  0x92   :  { %184 = vsyncadd [#allocation4], 4294967168 }
  0x93   :  { %96 = vsyncpa [#allocation3], 1 }
  0x94   :  { %97 = vsyncpa [#allocation6], 1 }
  0x95   :  { %98 = vsyncpa [#allocation4], 1 }

</bundles_post_ra>
